<compile_context>
chip_gen: v5e
topology: v5e:2x2
jax: 0.10.0
libtpu: 0.0.40
codegen_flags: <defaults>
</compile_context>

<pallas_src>
import jax
import jax.numpy as jnp
from jax.experimental import pallas as pl
from jax.experimental.pallas import tpu as pltpu


# ----------------------------------------------------------------------------
# Pallas kernel
# ----------------------------------------------------------------------------
def fusion_head_kernel(
    # streamed activations (one batch tile each)
    x_cell_ref, drug_ref, dose_ab_ref,
    # fused dose-encoder params (prepared in wrapper)
    de_w1a_ref, de_w1b_ref, de_b1_ref, de_w2_ref, de_b2_ref,
    # fc1 split weights + bias (lane-padded)
    w1_cell_ref, w1_drug_ref, w1_dose_ref, fc_b1_ref,
    # fc2 / fc3 params (lane-padded); fc_b3 is an SMEM scalar
    fc_w2_ref, fc_b2_ref, fc_w3_ref, fc_b3_ref,
    # output
    out_ref,
):
    f32 = jnp.float32

    # --- Fused dose encoder: lanes 0:31 carry doseA's hidden, 32:63 doseB's. ---
    da = dose_ab_ref[:, 0:1]                                         # (TB, 1) f32
    db = dose_ab_ref[:, 1:2]                                         # (TB, 1) f32
    # Linear(1,32) for both doses as two broadcast mul-adds (no matmul, no concat):
    #   de_w1a = [W1 | 0], de_w1b = [0 | W1], de_b1 = [b1 | b1]
    h1 = da * de_w1a_ref[...] + db * de_w1b_ref[...] + de_b1_ref[...]
    h1 = jnp.maximum(h1, 0.0).astype(de_w2_ref.dtype)                # (TB, 64) bf16
    # Linear(32,64) for both doses via block-diagonal W2 -> (TB,128)=[embA|embB]
    dose_emb = jnp.dot(h1, de_w2_ref[...], preferred_element_type=f32)
    dose_emb = jnp.maximum(dose_emb + de_b2_ref[...], 0.0)
    dose_emb = dose_emb.astype(w1_dose_ref.dtype)                    # (TB, 128) bf16

    # --- fc1 as a sum of three dots (replaces lane-axis concat + single dot) ---
    acc = jnp.dot(x_cell_ref[...], w1_cell_ref[...], preferred_element_type=f32)
    acc += jnp.dot(drug_ref[...], w1_drug_ref[...], preferred_element_type=f32)
    acc += jnp.dot(dose_emb, w1_dose_ref[...], preferred_element_type=f32)
    h = jnp.maximum(acc + fc_b1_ref[...], 0.0)                       # (TB, H1P) f32
    # Dropout(p=0.2): identity in eval mode.
    h = h.astype(fc_w2_ref.dtype)                                    # bf16 for MXU

    # --- fc2 ---
    g = jnp.dot(h, fc_w2_ref[...], preferred_element_type=f32) + fc_b2_ref[...]
    g = jnp.maximum(g, 0.0)                                          # (TB, H2P) f32
    # Dropout(p=0.2): identity in eval mode.

    # --- fc3: Linear(H2, 1) as VPU multiply + lane reduce (no N=1 MXU matmul) ---
    out = jnp.sum(g * fc_w3_ref[...], axis=-1, keepdims=True) + fc_b3_ref[0, 0]
    out_ref[...] = out.astype(out_ref.dtype)


# ----------------------------------------------------------------------------
# Wrapper: weight preprocessing (pure layout, no math change) + batch grid.
# ----------------------------------------------------------------------------
def _round_up(x, m):
    return ((x + m - 1) // m) * m


def _pick_vmem_limit():
    # Generation-aware scoped-VMEM cap: 64 MiB on 128-MiB parts (v5e/v6e),
    # half capacity (32 MiB) on 64-MiB v7x-class parts, never below 32 MiB.
    try:
        cap = pltpu.get_tpu_info().vmem_capacity_bytes
    except Exception:
        cap = 128 * 1024 * 1024
    return int(min(64 * 1024 * 1024, max(32 * 1024 * 1024, cap // 2)))


def fusion_head_forward(x_cell_embed, drug_embed, dose_a, dose_b, params,
                        *, batch_tile=1024):
    f32 = jnp.float32
    bf16 = jnp.bfloat16
    batch = x_cell_embed.shape[0]
    cell_dim = x_cell_embed.shape[1]
    drug_dim = drug_embed.shape[1]

    de_w1 = params["de_w1"].astype(f32)    # (1, 32)
    de_b1 = params["de_b1"].astype(f32)    # (1, 32)
    de_w2 = params["de_w2"].astype(f32)    # (32, 64)
    de_b2 = params["de_b2"].astype(f32)    # (1, 64)
    fc_w1 = params["fc_w1"].astype(f32)    # (F, H1)
    fc_b1 = params["fc_b1"].astype(f32)    # (1, H1)
    fc_w2 = params["fc_w2"].astype(f32)    # (H1, H2)
    fc_b2 = params["fc_b2"].astype(f32)    # (1, H2)
    fc_w3 = params["fc_w3"].astype(f32)    # (H2, 1)
    fc_b3 = params["fc_b3"].astype(f32)    # (1, 1)

    h1 = fc_w1.shape[1]
    h2 = fc_w2.shape[1]
    h1p = _round_up(h1, 128)           # 160 -> 256
    h2p = _round_up(h2, 128)           # 80  -> 128
    dose_dim = fc_w1.shape[0] - cell_dim - drug_dim   # 128 (= 2*64)

    # Fused dose-encoder params: doseA hidden in lanes 0:31, doseB in 32:63.
    z32 = jnp.zeros((1, 32), f32)
    de_w1a = jnp.concatenate([de_w1, z32], axis=1)                 # (1, 64) f32 (VPU)
    de_w1b = jnp.concatenate([z32, de_w1], axis=1)                 # (1, 64) f32 (VPU)
    de_b1t = jnp.concatenate([de_b1, de_b1], axis=1)               # (1, 64) f32
    de_w2b = jnp.zeros((64, 128), f32)
    de_w2b = de_w2b.at[:32, :64].set(de_w2)
    de_w2b = de_w2b.at[32:, 64:].set(de_w2)                        # block-diag
    de_w2b = de_w2b.astype(bf16)                                   # MXU operand
    de_b2t = jnp.concatenate([de_b2, de_b2], axis=1)               # (1, 128) f32

    # Split + lane-pad fc1 weights (zero-padded columns stay zero end-to-end).
    pad_h1 = h1p - h1
    pad_h2 = h2p - h2
    w1_cell = jnp.pad(fc_w1[:cell_dim], ((0, 0), (0, pad_h1))).astype(bf16)
    w1_drug = jnp.pad(fc_w1[cell_dim:cell_dim + drug_dim],
                      ((0, 0), (0, pad_h1))).astype(bf16)
    w1_dose = jnp.pad(fc_w1[cell_dim + drug_dim:],
                      ((0, 0), (0, pad_h1))).astype(bf16)
    fc_b1p = jnp.pad(fc_b1, ((0, 0), (0, pad_h1)))                 # f32
    fc_w2p = jnp.pad(fc_w2, ((0, pad_h1), (0, pad_h2))).astype(bf16)   # (H1P, H2P)
    fc_b2p = jnp.pad(fc_b2, ((0, 0), (0, pad_h2)))                 # f32
    fc_w3r = jnp.pad(fc_w3.T, ((0, 0), (0, pad_h2)))               # (1, H2P) f32 (VPU)

    # Streamed activations: bf16 embeddings, doses packed into one (B, 2) stream.
    x_cell_bf = x_cell_embed.astype(bf16)
    drug_bf = drug_embed.astype(bf16)
    dose_ab = jnp.concatenate([dose_a, dose_b], axis=1).astype(f32)    # (B, 2)

    vmem_limit = _pick_vmem_limit()

    # Cap the batch tile so double-buffered bf16 activations + f32 intermediates fit
    # comfortably in half the scoped-VMEM budget (weights are resident and small).
    act_row = 2 * 2 * (cell_dim + drug_dim) + 2 * 4 * 2            # bf16 x2 bufs + dose
    inter_row = 4 * (2 * h1p + 3 * h2p + 2 * 128 + 64)             # rough f32 intermediates
    tb_vmem_cap = max(8, ((vmem_limit // 2) // (act_row + inter_row)) // 8 * 8)

    # Keep >= 2 grid steps when batch allows so both v7x TensorCores get work.
    tb_split_cap = _round_up(-(-batch // 2), 8)

    batch_tile = max(8, _round_up(batch_tile, 8))
    tb = max(8, min(batch_tile, tb_vmem_cap, tb_split_cap))
    bp = _round_up(batch, tb)
    if bp != batch:
        pad_rows = ((0, bp - batch), (0, 0))
        x_cell_bf = jnp.pad(x_cell_bf, pad_rows)
        drug_bf = jnp.pad(drug_bf, pad_rows)
        dose_ab = jnp.pad(dose_ab, pad_rows)
    grid = (bp // tb,)

    def act_spec(width):
        return pl.BlockSpec((tb, width), lambda i: (i, 0))

    def res_spec(shape):
        # Resident weight: same block every grid step -> fetched once, stays in VMEM.
        return pl.BlockSpec(shape, lambda i: (0, 0))

    flops = 2 * bp * (64 * 128 + cell_dim * h1p + drug_dim * h1p
                      + dose_dim * h1p + h1p * h2p + h2p)
    bytes_accessed = (2 * bp * (cell_dim + drug_dim)           # bf16 activations
                      + 4 * bp * 3                             # doses + output
                      + 2 * (64 * 128 + (cell_dim + drug_dim + dose_dim) * h1p
                             + h1p * h2p)                      # bf16 weights
                      + 4 * (3 * 64 + 128 + h1p + 2 * h2p + 1))  # f32 biases etc.

    out = pl.pallas_call(
        fusion_head_kernel,
        out_shape=jax.ShapeDtypeStruct((bp, 1), f32),
        grid=grid,
        in_specs=[
            act_spec(cell_dim), act_spec(drug_dim), act_spec(2),
            res_spec((1, 64)), res_spec((1, 64)), res_spec((1, 64)),
            res_spec((64, 128)), res_spec((1, 128)),
            res_spec((cell_dim, h1p)), res_spec((drug_dim, h1p)),
            res_spec((dose_dim, h1p)), res_spec((1, h1p)),
            res_spec((h1p, h2p)), res_spec((1, h2p)), res_spec((1, h2p)),
            pl.BlockSpec(memory_space=pltpu.MemorySpace.SMEM),   # fc_b3 scalar
        ],
        out_specs=pl.BlockSpec((tb, 1), lambda i: (i, 0)),
        compiler_params=pltpu.CompilerParams(
            dimension_semantics=("parallel",),
            vmem_limit_bytes=vmem_limit,
        ),
        cost_estimate=pl.CostEstimate(
            flops=int(flops), transcendentals=0, bytes_accessed=int(bytes_accessed)),
    )(
        x_cell_bf, drug_bf, dose_ab,
        de_w1a, de_w1b, de_b1t, de_w2b, de_b2t,
        w1_cell, w1_drug, w1_dose, fc_b1p,
        fc_w2p, fc_b2p, fc_w3r, fc_b3,
    )
    return out[:batch]


# ----------------------------------------------------------------------------
# Pure-JAX reference (mirrors the PyTorch forward, eval mode, f32 HIGHEST).
# ----------------------------------------------------------------------------
def fusion_head_reference(x_cell_embed, drug_embed, dose_a, dose_b, params):
    hp = jax.lax.Precision.HIGHEST

    def encode(d):
        h = jnp.maximum(jnp.dot(d, params["de_w1"], precision=hp) + params["de_b1"], 0.0)
        return jnp.maximum(jnp.dot(h, params["de_w2"], precision=hp) + params["de_b2"], 0.0)

    ea = encode(dose_a)
    eb = encode(dose_b)
    x = jnp.concatenate([x_cell_embed, drug_embed, ea, eb], axis=1)
    h = jnp.maximum(jnp.dot(x, params["fc_w1"], precision=hp) + params["fc_b1"], 0.0)
    h = jnp.maximum(jnp.dot(h, params["fc_w2"], precision=hp) + params["fc_b2"], 0.0)
    return jnp.dot(h, params["fc_w3"], precision=hp) + params["fc_b3"]


# ----------------------------------------------------------------------------
# Deterministic parameter init (xavier_normal_ weights, zero biases — matches
# FusionHead.init_weights()).  Weights stored as (in, out): x @ W + b.
# ----------------------------------------------------------------------------
def xavier_normal(key, fan_in, fan_out):
    std = (2.0 / (fan_in + fan_out)) ** 0.5
    return std * jax.random.normal(key, (fan_in, fan_out), dtype=jnp.float32)


def make_params(key, out_channels):
    dose_dim = 64 * 2
    fusion_input_dim = out_channels * 40 + dose_dim
    h1 = out_channels * 20
    h2 = out_channels * 10
    keys = jax.random.split(key, 5)
    return {
        "de_w1": xavier_normal(keys[0], 1, 32),
        "de_b1": jnp.zeros((1, 32), jnp.float32),
        "de_w2": xavier_normal(keys[1], 32, 64),
        "de_b2": jnp.zeros((1, 64), jnp.float32),
        "fc_w1": xavier_normal(keys[2], fusion_input_dim, h1),
        "fc_b1": jnp.zeros((1, h1), jnp.float32),
        "fc_w2": xavier_normal(keys[3], h1, h2),
        "fc_b2": jnp.zeros((1, h2), jnp.float32),
        "fc_w3": xavier_normal(keys[4], h2, 1),
        "fc_b3": jnp.zeros((1, 1), jnp.float32),
    }


if __name__ == "__main__":
    # Small config consistent with the module: out_channels=8
    #   fusion_input_dim = 8*40 + 128 = 448
    #   x_cell_embed + drug_embed features must sum to out_channels*40 = 320
    OUT_CHANNELS = 8
    BATCH = 8
    CELL_DIM = OUT_CHANNELS * 20   # 160
    DRUG_DIM = OUT_CHANNELS * 20   # 160

    # Kernel runs bf16 matmul operands with f32 accumulation; reference is full
    # f32 HIGHEST, so the tolerance below accounts for bf16 input quantization.
    RTOL, ATOL = 2e-2, 5e-2

    root = jax.random.PRNGKey(0)
    k_params, k_cell, k_drug, k_da, k_db = jax.random.split(root, 5)
    params = make_params(k_params, OUT_CHANNELS)

    x_cell_embed = jax.random.normal(k_cell, (BATCH, CELL_DIM), dtype=jnp.float32)
    drug_embed = jax.random.normal(k_drug, (BATCH, DRUG_DIM), dtype=jnp.float32)
    dose_a = jax.random.uniform(k_da, (BATCH, 1), dtype=jnp.float32)
    dose_b = jax.random.uniform(k_db, (BATCH, 1), dtype=jnp.float32)

    out = fusion_head_forward(x_cell_embed, drug_embed, dose_a, dose_b, params)
    out = jax.block_until_ready(out)
    assert out.shape == (BATCH, 1) and out.dtype == jnp.float32
    ref = fusion_head_reference(x_cell_embed, drug_embed, dose_a, dose_b, params)
    assert jnp.allclose(out, ref, rtol=RTOL, atol=ATOL), (
        f"max abs diff {float(jnp.max(jnp.abs(out - ref)))}")

    # Exercise the multi-step batch grid + padding path (3 grid steps, non-multiple batch).
    B2 = 40
    k_cell2, k_drug2, k_da2, k_db2 = jax.random.split(jax.random.PRNGKey(1), 4)
    xc2 = jax.random.normal(k_cell2, (B2, CELL_DIM), dtype=jnp.float32)
    dr2 = jax.random.normal(k_drug2, (B2, DRUG_DIM), dtype=jnp.float32)
    da2 = jax.random.uniform(k_da2, (B2, 1), dtype=jnp.float32)
    db2 = jax.random.uniform(k_db2, (B2, 1), dtype=jnp.float32)
    out2 = fusion_head_forward(xc2, dr2, da2, db2, params, batch_tile=16)
    out2 = jax.block_until_ready(out2)
    ref2 = fusion_head_reference(xc2, dr2, da2, db2, params)
    assert out2.shape == (B2, 1)
    assert jnp.allclose(out2, ref2, rtol=RTOL, atol=ATOL), (
        f"max abs diff {float(jnp.max(jnp.abs(out2 - ref2)))}")

    print("KERNEL_OK")
</pallas_src>

<mosaic_0001>
module attributes {stable_mosaic.version = 11 : i64} {
  func.func @fusion_head_kernel(%arg0: i32, %arg1: memref<8x160xbf16, #tpu.memory_space<vmem>>, %arg2: memref<8x160xbf16, #tpu.memory_space<vmem>>, %arg3: memref<8x2xf32, #tpu.memory_space<vmem>>, %arg4: memref<1x64xf32, #tpu.memory_space<vmem>>, %arg5: memref<1x64xf32, #tpu.memory_space<vmem>>, %arg6: memref<1x64xf32, #tpu.memory_space<vmem>>, %arg7: memref<64x128xbf16, #tpu.memory_space<vmem>>, %arg8: memref<1x128xf32, #tpu.memory_space<vmem>>, %arg9: memref<160x256xbf16, #tpu.memory_space<vmem>>, %arg10: memref<160x256xbf16, #tpu.memory_space<vmem>>, %arg11: memref<128x256xbf16, #tpu.memory_space<vmem>>, %arg12: memref<1x256xf32, #tpu.memory_space<vmem>>, %arg13: memref<256x128xbf16, #tpu.memory_space<vmem>>, %arg14: memref<1x128xf32, #tpu.memory_space<vmem>>, %arg15: memref<1x128xf32, #tpu.memory_space<vmem>>, %arg16: memref<1x1xf32, #tpu.memory_space<smem>>, %arg17: memref<8x1xf32, #tpu.memory_space<vmem>>) attributes {dimension_semantics = [#tpu.dimension_semantics<parallel>], iteration_bounds = array<i64: 1>, scalar_prefetch = 0 : i64, scratch_operands = 0 : i64, tpu.core_type = #tpu.core_type<tc>, window_params = [{transform_indices = @transform_0, window_bounds = array<i64: 8, 160>}, {transform_indices = @transform_1, window_bounds = array<i64: 8, 160>}, {transform_indices = @transform_2, window_bounds = array<i64: 8, 2>}, {pipeline_mode = #tpu.pipeline_mode<synchronous>, transform_indices = @transform_3, window_bounds = array<i64: 1, 64>}, {pipeline_mode = #tpu.pipeline_mode<synchronous>, transform_indices = @transform_4, window_bounds = array<i64: 1, 64>}, {pipeline_mode = #tpu.pipeline_mode<synchronous>, transform_indices = @transform_5, window_bounds = array<i64: 1, 64>}, {pipeline_mode = #tpu.pipeline_mode<synchronous>, transform_indices = @transform_6, window_bounds = array<i64: 64, 128>}, {pipeline_mode = #tpu.pipeline_mode<synchronous>, transform_indices = @transform_7, window_bounds = array<i64: 1, 128>}, {pipeline_mode = #tpu.pipeline_mode<synchronous>, transform_indices = @transform_8, window_bounds = array<i64: 160, 256>}, {pipeline_mode = #tpu.pipeline_mode<synchronous>, transform_indices = @transform_9, window_bounds = array<i64: 160, 256>}, {pipeline_mode = #tpu.pipeline_mode<synchronous>, transform_indices = @transform_10, window_bounds = array<i64: 128, 256>}, {pipeline_mode = #tpu.pipeline_mode<synchronous>, transform_indices = @transform_11, window_bounds = array<i64: 1, 256>}, {pipeline_mode = #tpu.pipeline_mode<synchronous>, transform_indices = @transform_12, window_bounds = array<i64: 256, 128>}, {pipeline_mode = #tpu.pipeline_mode<synchronous>, transform_indices = @transform_13, window_bounds = array<i64: 1, 128>}, {pipeline_mode = #tpu.pipeline_mode<synchronous>, transform_indices = @transform_14, window_bounds = array<i64: 1, 128>}, {transform_indices = @transform_15, window_bounds = array<i64: 1, 1>}, {transform_indices = @transform_16, window_bounds = array<i64: 8, 1>}]} {
    %c0 = arith.constant 0 : index
    %c0_0 = arith.constant 0 : index
    %0 = vector.load %arg3[%c0, %c0_0] : memref<8x2xf32, #tpu.memory_space<vmem>>, vector<8x1xf32>
    %c0_1 = arith.constant 0 : index
    %c1 = arith.constant 1 : index
    %1 = vector.load %arg3[%c0_1, %c1] : memref<8x2xf32, #tpu.memory_space<vmem>>, vector<8x1xf32>
    %c0_2 = arith.constant 0 : index
    %c0_3 = arith.constant 0 : index
    %2 = vector.load %arg4[%c0_2, %c0_3] : memref<1x64xf32, #tpu.memory_space<vmem>>, vector<1x64xf32>
    %3 = vector.broadcast %0 : vector<8x1xf32> to vector<8x64xf32>
    %4 = vector.broadcast %2 : vector<1x64xf32> to vector<8x64xf32>
    %5 = arith.mulf %3, %4 : vector<8x64xf32>
    %c0_4 = arith.constant 0 : index
    %c0_5 = arith.constant 0 : index
    %6 = vector.load %arg5[%c0_4, %c0_5] : memref<1x64xf32, #tpu.memory_space<vmem>>, vector<1x64xf32>
    %7 = vector.broadcast %1 : vector<8x1xf32> to vector<8x64xf32>
    %8 = vector.broadcast %6 : vector<1x64xf32> to vector<8x64xf32>
    %9 = arith.mulf %7, %8 : vector<8x64xf32>
    %10 = arith.addf %5, %9 : vector<8x64xf32>
    %c0_6 = arith.constant 0 : index
    %c0_7 = arith.constant 0 : index
    %11 = vector.load %arg6[%c0_6, %c0_7] : memref<1x64xf32, #tpu.memory_space<vmem>>, vector<1x64xf32>
    %12 = vector.broadcast %11 : vector<1x64xf32> to vector<8x64xf32>
    %13 = arith.addf %10, %12 : vector<8x64xf32>
    %cst = arith.constant 0.000000e+00 : f32
    %14 = vector.broadcast %cst : f32 to vector<8x64xf32>
    %15 = arith.maximumf %13, %14 : vector<8x64xf32>
    %16 = arith.truncf %15 : vector<8x64xf32> to vector<8x64xbf16>
    %c0_8 = arith.constant 0 : index
    %c0_9 = arith.constant 0 : index
    %17 = vector.load %arg7[%c0_8, %c0_9] : memref<64x128xbf16, #tpu.memory_space<vmem>>, vector<64x128xbf16>
    %cst_10 = arith.constant dense<0.000000e+00> : vector<8x128xf32>
    %18 = tpu.matmul %16, %17, %cst_10 {dimension_numbers = #tpu.dot_dimension_numbers<[1], [0], [0], [1], [0, 0, 1, 1], [], []>} : vector<8x64xbf16>, vector<64x128xbf16>, vector<8x128xf32> -> vector<8x128xf32>
    %c0_11 = arith.constant 0 : index
    %c0_12 = arith.constant 0 : index
    %19 = vector.load %arg8[%c0_11, %c0_12] : memref<1x128xf32, #tpu.memory_space<vmem>>, vector<1x128xf32>
    %20 = vector.broadcast %19 : vector<1x128xf32> to vector<8x128xf32>
    %21 = arith.addf %18, %20 : vector<8x128xf32>
    %cst_13 = arith.constant 0.000000e+00 : f32
    %22 = vector.broadcast %cst_13 : f32 to vector<8x128xf32>
    %23 = arith.maximumf %21, %22 : vector<8x128xf32>
    %24 = arith.truncf %23 : vector<8x128xf32> to vector<8x128xbf16>
    %c0_14 = arith.constant 0 : index
    %c0_15 = arith.constant 0 : index
    %25 = vector.load %arg1[%c0_14, %c0_15] : memref<8x160xbf16, #tpu.memory_space<vmem>>, vector<8x160xbf16>
    %c0_16 = arith.constant 0 : index
    %c0_17 = arith.constant 0 : index
    %26 = vector.load %arg9[%c0_16, %c0_17] : memref<160x256xbf16, #tpu.memory_space<vmem>>, vector<160x256xbf16>
    %cst_18 = arith.constant dense<0.000000e+00> : vector<8x256xf32>
    %27 = tpu.matmul %25, %26, %cst_18 {dimension_numbers = #tpu.dot_dimension_numbers<[1], [0], [0], [1], [0, 0, 1, 1], [], []>} : vector<8x160xbf16>, vector<160x256xbf16>, vector<8x256xf32> -> vector<8x256xf32>
    %c0_19 = arith.constant 0 : index
    %c0_20 = arith.constant 0 : index
    %28 = vector.load %arg2[%c0_19, %c0_20] : memref<8x160xbf16, #tpu.memory_space<vmem>>, vector<8x160xbf16>
    %c0_21 = arith.constant 0 : index
    %c0_22 = arith.constant 0 : index
    %29 = vector.load %arg10[%c0_21, %c0_22] : memref<160x256xbf16, #tpu.memory_space<vmem>>, vector<160x256xbf16>
    %cst_23 = arith.constant dense<0.000000e+00> : vector<8x256xf32>
    %30 = tpu.matmul %28, %29, %cst_23 {dimension_numbers = #tpu.dot_dimension_numbers<[1], [0], [0], [1], [0, 0, 1, 1], [], []>} : vector<8x160xbf16>, vector<160x256xbf16>, vector<8x256xf32> -> vector<8x256xf32>
    %31 = arith.addf %27, %30 : vector<8x256xf32>
    %c0_24 = arith.constant 0 : index
    %c0_25 = arith.constant 0 : index
    %32 = vector.load %arg11[%c0_24, %c0_25] : memref<128x256xbf16, #tpu.memory_space<vmem>>, vector<128x256xbf16>
    %cst_26 = arith.constant dense<0.000000e+00> : vector<8x256xf32>
    %33 = tpu.matmul %24, %32, %cst_26 {dimension_numbers = #tpu.dot_dimension_numbers<[1], [0], [0], [1], [0, 0, 1, 1], [], []>} : vector<8x128xbf16>, vector<128x256xbf16>, vector<8x256xf32> -> vector<8x256xf32>
    %34 = arith.addf %31, %33 : vector<8x256xf32>
    %c0_27 = arith.constant 0 : index
    %c0_28 = arith.constant 0 : index
    %35 = vector.load %arg12[%c0_27, %c0_28] : memref<1x256xf32, #tpu.memory_space<vmem>>, vector<1x256xf32>
    %36 = vector.broadcast %35 : vector<1x256xf32> to vector<8x256xf32>
    %37 = arith.addf %34, %36 : vector<8x256xf32>
    %cst_29 = arith.constant 0.000000e+00 : f32
    %38 = vector.broadcast %cst_29 : f32 to vector<8x256xf32>
    %39 = arith.maximumf %37, %38 : vector<8x256xf32>
    %40 = arith.truncf %39 : vector<8x256xf32> to vector<8x256xbf16>
    %c0_30 = arith.constant 0 : index
    %c0_31 = arith.constant 0 : index
    %41 = vector.load %arg13[%c0_30, %c0_31] : memref<256x128xbf16, #tpu.memory_space<vmem>>, vector<256x128xbf16>
    %cst_32 = arith.constant dense<0.000000e+00> : vector<8x128xf32>
    %42 = tpu.matmul %40, %41, %cst_32 {dimension_numbers = #tpu.dot_dimension_numbers<[1], [0], [0], [1], [0, 0, 1, 1], [], []>} : vector<8x256xbf16>, vector<256x128xbf16>, vector<8x128xf32> -> vector<8x128xf32>
    %c0_33 = arith.constant 0 : index
    %c0_34 = arith.constant 0 : index
    %43 = vector.load %arg14[%c0_33, %c0_34] : memref<1x128xf32, #tpu.memory_space<vmem>>, vector<1x128xf32>
    %44 = vector.broadcast %43 : vector<1x128xf32> to vector<8x128xf32>
    %45 = arith.addf %42, %44 : vector<8x128xf32>
    %cst_35 = arith.constant 0.000000e+00 : f32
    %46 = vector.broadcast %cst_35 : f32 to vector<8x128xf32>
    %47 = arith.maximumf %45, %46 : vector<8x128xf32>
    %c0_36 = arith.constant 0 : index
    %c0_37 = arith.constant 0 : index
    %48 = vector.load %arg15[%c0_36, %c0_37] : memref<1x128xf32, #tpu.memory_space<vmem>>, vector<1x128xf32>
    %49 = vector.broadcast %48 : vector<1x128xf32> to vector<8x128xf32>
    %50 = arith.mulf %47, %49 : vector<8x128xf32>
    %cst_38 = arith.constant dense<0.000000e+00> : vector<8xf32>
    %51 = vector.multi_reduction <add>, %50, %cst_38 [1] : vector<8x128xf32> to vector<8xf32>
    %52 = vector.shape_cast %51 : vector<8xf32> to vector<8x1xf32>
    %c0_39 = arith.constant 0 : index
    %c0_40 = arith.constant 0 : index
    %53 = memref.load %arg16[%c0_39, %c0_40] : memref<1x1xf32, #tpu.memory_space<smem>>
    %54 = vector.broadcast %53 : f32 to vector<8x1xf32>
    %55 = arith.addf %52, %54 : vector<8x1xf32>
    %c0_41 = arith.constant 0 : index
    %c0_42 = arith.constant 0 : index
    %56 = vector.load %arg17[%c0_41, %c0_42] : memref<8x1xf32, #tpu.memory_space<vmem>>, vector<8x1xf32>
    tpu.vector_store %arg17[%c0_41, %c0_42], %55 {strides = array<i32>} : memref<8x1xf32, #tpu.memory_space<vmem>>, vector<8x1xf32>,
    return
  }
  func.func @transform_0(%arg0: i32) -> (i32, i32) {
    %c0_i32 = arith.constant 0 : i32
    %c0_i32_0 = arith.constant 0 : i32
    return %arg0, %c0_i32 : i32, i32
  }
  func.func @transform_1(%arg0: i32) -> (i32, i32) {
    %c0_i32 = arith.constant 0 : i32
    %c0_i32_0 = arith.constant 0 : i32
    return %arg0, %c0_i32 : i32, i32
  }
  func.func @transform_2(%arg0: i32) -> (i32, i32) {
    %c0_i32 = arith.constant 0 : i32
    %c0_i32_0 = arith.constant 0 : i32
    return %arg0, %c0_i32 : i32, i32
  }
  func.func @transform_3(%arg0: i32) -> (i32, i32) {
    %c0_i32 = arith.constant 0 : i32
    %c0_i32_0 = arith.constant 0 : i32
    %c0_i32_1 = arith.constant 0 : i32
    return %c0_i32, %c0_i32_0 : i32, i32
  }
  func.func @transform_4(%arg0: i32) -> (i32, i32) {
    %c0_i32 = arith.constant 0 : i32
    %c0_i32_0 = arith.constant 0 : i32
    %c0_i32_1 = arith.constant 0 : i32
    return %c0_i32, %c0_i32_0 : i32, i32
  }
  func.func @transform_5(%arg0: i32) -> (i32, i32) {
    %c0_i32 = arith.constant 0 : i32
    %c0_i32_0 = arith.constant 0 : i32
    %c0_i32_1 = arith.constant 0 : i32
    return %c0_i32, %c0_i32_0 : i32, i32
  }
  func.func @transform_6(%arg0: i32) -> (i32, i32) {
    %c0_i32 = arith.constant 0 : i32
    %c0_i32_0 = arith.constant 0 : i32
    %c0_i32_1 = arith.constant 0 : i32
    return %c0_i32, %c0_i32_0 : i32, i32
  }
  func.func @transform_7(%arg0: i32) -> (i32, i32) {
    %c0_i32 = arith.constant 0 : i32
    %c0_i32_0 = arith.constant 0 : i32
    %c0_i32_1 = arith.constant 0 : i32
    return %c0_i32, %c0_i32_0 : i32, i32
  }
  func.func @transform_8(%arg0: i32) -> (i32, i32) {
    %c0_i32 = arith.constant 0 : i32
    %c0_i32_0 = arith.constant 0 : i32
    %c0_i32_1 = arith.constant 0 : i32
    return %c0_i32, %c0_i32_0 : i32, i32
  }
  func.func @transform_9(%arg0: i32) -> (i32, i32) {
    %c0_i32 = arith.constant 0 : i32
    %c0_i32_0 = arith.constant 0 : i32
    %c0_i32_1 = arith.constant 0 : i32
    return %c0_i32, %c0_i32_0 : i32, i32
  }
  func.func @transform_10(%arg0: i32) -> (i32, i32) {
    %c0_i32 = arith.constant 0 : i32
    %c0_i32_0 = arith.constant 0 : i32
    %c0_i32_1 = arith.constant 0 : i32
    return %c0_i32, %c0_i32_0 : i32, i32
  }
  func.func @transform_11(%arg0: i32) -> (i32, i32) {
    %c0_i32 = arith.constant 0 : i32
    %c0_i32_0 = arith.constant 0 : i32
    %c0_i32_1 = arith.constant 0 : i32
    return %c0_i32, %c0_i32_0 : i32, i32
  }
  func.func @transform_12(%arg0: i32) -> (i32, i32) {
    %c0_i32 = arith.constant 0 : i32
    %c0_i32_0 = arith.constant 0 : i32
    %c0_i32_1 = arith.constant 0 : i32
    return %c0_i32, %c0_i32_0 : i32, i32
  }
  func.func @transform_13(%arg0: i32) -> (i32, i32) {
    %c0_i32 = arith.constant 0 : i32
    %c0_i32_0 = arith.constant 0 : i32
    %c0_i32_1 = arith.constant 0 : i32
    return %c0_i32, %c0_i32_0 : i32, i32
  }
  func.func @transform_14(%arg0: i32) -> (i32, i32) {
    %c0_i32 = arith.constant 0 : i32
    %c0_i32_0 = arith.constant 0 : i32
    %c0_i32_1 = arith.constant 0 : i32
    return %c0_i32, %c0_i32_0 : i32, i32
  }
  func.func @transform_15(%arg0: i32) -> (i32, i32) {
    %c0_i32 = arith.constant 0 : i32
    %c0_i32_0 = arith.constant 0 : i32
    %c0_i32_1 = arith.constant 0 : i32
    return %c0_i32, %c0_i32_0 : i32, i32
  }
  func.func @transform_16(%arg0: i32) -> (i32, i32) {
    %c0_i32 = arith.constant 0 : i32
    %c0_i32_0 = arith.constant 0 : i32
    return %arg0, %c0_i32 : i32, i32
  }
}

</mosaic_0001>

<bundles_post_ra>
// kernel: tpu_custom_call.1
= control target key start
LH: loop header
LB: loop body
LE: loop exit
PB: predicated region body
PF: predicated region fallthrough
CT: control target
= control target key end

     0   :  { %s1634_s0 = inlined_call_operand.vmem [shape: bf16[8,160], index: 0, kind: input, shape index: {}]   ;;  %s1635_s1 = inlined_call_operand.hbm [shape: bf16[8,160], index: 1, kind: input, shape index: {}]   ;;  %s1636_s2 = inlined_call_operand.vmem [shape: f32[8,2], index: 2, kind: input, shape index: {}]   ;;  %s1637_s3 = inlined_call_operand.vmem [shape: f32[1,64], index: 3, kind: input, shape index: {}]   ;;  %s1638_s4 = inlined_call_operand.vmem [shape: f32[1,64], index: 4, kind: input, shape index: {}]   ;;  %s1639_s5 = inlined_call_operand.vmem [shape: f32[1,64], index: 5, kind: input, shape index: {}]   ;;  %s1640_s6 = inlined_call_operand.hbm [shape: bf16[64,128], index: 6, kind: input, shape index: {}]   ;;  %s1641_s7 = inlined_call_operand.vmem [shape: f32[1,128], index: 7, kind: input, shape index: {}]   ;;  %s1642_s8 = inlined_call_operand.hbm [shape: bf16[160,256], index: 8, kind: input, shape index: {}]   ;;  %s1643_s9 = inlined_call_operand.hbm [shape: bf16[160,256], index: 9, kind: input, shape index: {}]   ;;  %s1644_s10 = inlined_call_operand.hbm [shape: bf16[128,256], index: 10, kind: input, shape index: {}]   ;;  %s1645_s11 = inlined_call_operand.vmem [shape: f32[1,256], index: 11, kind: input, shape index: {}]   ;;  %s1646_s12 = inlined_call_operand.hbm [shape: bf16[256,128], index: 12, kind: input, shape index: {}]   ;;  %s1647_s13 = inlined_call_operand.vmem [shape: f32[1,128], index: 13, kind: input, shape index: {}]   ;;  %s1648_s14 = inlined_call_operand.vmem [shape: f32[1,128], index: 14, kind: input, shape index: {}]   ;;  %s1649_s15 = inlined_call_operand.<no memory space> [shape: f32[1,1], index: 15, kind: input, shape index: {}]   ;;  %s1650_s16 = inlined_call_operand.vmem [shape: f32[8,1], index: 16, kind: output, shape index: {}]  }
   0x1   :  { %1652 = sst [smem:[#allocation17_spill]] %s1634_s0 }
   0x2   :  { %22 = vsyncpa [#allocation4], 0 }
   0x3   :  { %23 = vsyncpa [#allocation6], 0 }
   0x4   :  { %24 = vsyncpa [#allocation9], 0  ;;  %s51_s23 = sshll.u32 %s1640_s6, 4  ;;  %s52_s23 = int_to_ptr.hbm [resolvable:$true] %s51_s23 }
   0x5   :  { %25 = vsyncpa [#allocation12], 0  ;;  %s1467_s24 = smov [#allocation5]   ;;  %s1651_s26 = smov 64  }
   0x6   :  { %s53_s25 = sshll.u32 %s1467_s24, 4  ;;  %s1469_s27 = smov 4   ;;  %s54_s25 = int_to_ptr.vmem [resolvable:$true] %s53_s25 }
   0x7   :  { %59 = dma.hbm_to_vmem [thread:$0]  %s52_s23, 512, %s54_s25, [#allocation6], %s1651_s26, %s1651_s26, %s1469_s27  }
   0x8   :  { %s79_s30 = sshll.u32 %s1643_s9, 4  ;;  %s1470_s0 = smov [#allocation8]   ;;  %s80_s30 = int_to_ptr.hbm [resolvable:$true] %s79_s30 }
   0x9   :  { %s81_s17 = sshll.u32 %s1470_s0, 4  ;;  %s33_s19 = sshll.u32 %s1635_s1, 4  ;;  %s82_s17 = int_to_ptr.vmem [resolvable:$true] %s81_s17  ;;  %s34_s19 = int_to_ptr.hbm [resolvable:$true] %s33_s19 }
   0xa   :  { %s1471_s20 = smov 128   ;;  %s1472_s21 = smov 8  }
   0xb   :  { %87 = dma.hbm_to_vmem [thread:$0]  %s80_s30, 2560, %s82_s17, [#allocation9], %s1471_s20, %s1471_s20, %s1472_s21  }
   0xc   :  { %s66_s23 = sshll.u32 %s1642_s8, 4  ;;  %s1473_s25 = smov [#allocation3]   ;;  %s67_s23 = int_to_ptr.hbm [resolvable:$true] %s66_s23 }
   0xd   :  { %s35_s26 = sshll.u32 %s1473_s25, 4  ;;  %s1474_s9 = smov [#allocation7]   ;;  %s36_s26 = int_to_ptr.vmem [resolvable:$true] %s35_s26 }
   0xe   :  { %38 = dma.hbm_to_vmem [thread:$0]  %s34_s19, 128, %s36_s26, [#allocation4]  }
   0xf   :  { %s68_s28 = sshll.u32 %s1474_s9, 4  ;;  %s92_s1 = sshll.u32 %s1644_s10, 4  ;;  %s69_s28 = int_to_ptr.vmem [resolvable:$true] %s68_s28  ;;  %s93_s1 = int_to_ptr.hbm [resolvable:$true] %s92_s1 }
  0x10   :  { %74 = dma.hbm_to_vmem [thread:$0]  %s67_s23, 2560, %s69_s28, [#allocation6], %s1471_s20, %s1471_s20, %s1472_s21  }
  0x11   :  { %s107_s17 = sshll.u32 %s1646_s12, 4  ;;  %s1475_s6 = smov [#allocation10]   ;;  %s108_s17 = int_to_ptr.hbm [resolvable:$true] %s107_s17 }
  0x12   :  { %s94_s8 = sshll.u32 %s1475_s6, 4  ;;  %s1476_s22 = smov [#allocation11]   ;;  %s95_s8 = int_to_ptr.vmem [resolvable:$true] %s94_s8 }
  0x13   :  { %100 = dma.hbm_to_vmem [thread:$0]  %s93_s1, 2048, %s95_s8, [#allocation9], %s1471_s20, %s1471_s20, %s1472_s21  }
  0x14   :  { %s109_s26 = sshll.u32 %s1476_s22, 4  ;;  %s1653_s19 = smov 64   ;;  %s110_s26 = int_to_ptr.vmem [resolvable:$true] %s109_s26 }
  0x15   :  { %115 = dma.hbm_to_vmem [thread:$0]  %s108_s17, 2048, %s110_s26, [#allocation12], %s1653_s19, %s1653_s19, %s1469_s27  }
  0x16   :  { %1459 = dma.done.wait [#allocation4], 128  }
  0x17   :  { %1460 = vsyncadd [#allocation4], 4294967168 }
  0x18   :  { %1461 = dma.done.wait [#allocation6], 3072  }
  0x19   :  { %1462 = vsyncadd [#allocation6], 4294964224 }
  0x1a   :  { %1463 = dma.done.wait [#allocation9], 4608  }
  0x1b   :  { %1464 = vsyncadd [#allocation9], 4294962688 }
  0x1c   :  { %1465 = dma.done.wait [#allocation12], 2048  }
  0x1d   :  { %1466 = vsyncadd [#allocation12], 4294965248  ;;  %v1477_v0 = vmov 0   ;;  %v147_v1 = vld [vmem:[%s1636_s2] sm:$0xff]  ;;  %v1478_v2 = vmov 1   ;;  %v1221_v4 = vld [vmem:[#allocation5 + $0x10] sm:$0xff] }
  0x1e   :  { %1307 = vset.pattern.permute.xlu0 %v1477_v0  ;;  %v1222_v3 = vld [vmem:[#allocation5 + $0x18] sm:$0xff]  ;;  %v1220_v5 = vld [vmem:[#allocation5 + $0x8] sm:$0xff]  ;;  %v1219_v6 = vld [vmem:[#allocation5] sm:$0xff]  ;;  %vm378_vm0 = vcmask 261120   ;;  %vm211_vm1 = vcmask 523264   ;;  %s1654_s23 = sld [smem:[#allocation17_spill]] }
  0x1f   :  { %151 = vperm.xlu0 %1307, %v147_v1   ;;  %219 = vmatpush.bf16.msra.mxu0 %v1222_v3  ;;  %v985_v7 = vld [vmem:[#allocation8 + $0x70] sm:$0xf]  ;;  %v1258_v8 = vld [vmem:[#allocation8 + $0x74] sm:$0xf0]  ;;  %v977_v12 = vld [vmem:[#allocation8 + $0x60] sm:$0xf] }
  0x20   :  { %v1001_v9 = vld [vmem:[#allocation8 + $0x90] sm:$0xf]  ;;  %v986_v10 = vor.u32 %v1258_v8, %v985_v7  ;;  %v1262_v11 = vld [vmem:[#allocation8 + $0x94] sm:$0xf0]  ;;  %v1256_v13 = vld [vmem:[#allocation8 + $0x64] sm:$0xf0] }
  0x21   :  { %v1002_v14 = vor.u32 %v1262_v11, %v1001_v9  ;;  %v993_v15 = vld [vmem:[#allocation8 + $0x80] sm:$0xf]  ;;  %v1260_v16 = vld [vmem:[#allocation8 + $0x84] sm:$0xf0]  ;;  %v978_v17 = vor.u32 %v1256_v13, %v977_v12  ;;  %v1591_v18 = vld [vmem:[#allocation3] sm:$0xff]  ;;  %vm900_vm2 = vcmask 7168  }
  0x22   :  { %382 = vmatpush.bf16.msra.mxu1 %v986_v10  ;;  %v1257_v19 = vld [vmem:[#allocation8 + $0x74] sm:$0xf]  ;;  %v994_v20 = vor.u32 %v1260_v16, %v993_v15  ;;  %v969_v21 = vld [vmem:[#allocation8 + $0x50] sm:$0xf]  ;;  %v1254_v22 = vld [vmem:[#allocation8 + $0x54] sm:$0xf0]  ;;  %v274_v23 = vunpack.c.h.b16 %v1591_v18 }
  0x23   :  { %220 = vmatpush.bf16.msra.mxu0 %v1221_v4  ;;  %401 = vmatpush.bf16.msra.mxu2 %v1002_v14  ;;  %v987_v24 = vld [vmem:[#allocation8 + $0x78] sm:$0xf0]  ;;  %v1255_v26 = vld [vmem:[#allocation8 + $0x64] sm:$0xf]  ;;  %v979_v27 = vld [vmem:[#allocation8 + $0x68] sm:$0xf0]  ;;  %v970_v30 = vor.u32 %v1254_v22, %v969_v21 }
  0x24   :  { %v990_v25 = vor.u32 %v1257_v19, %v987_v24  ;;  %v1067_v28 = vld [vmem:[#allocation7 + $0x70] sm:$0xf]  ;;  %v1238_v29 = vld [vmem:[#allocation7 + $0x74] sm:$0xf0]  ;;  %v1594_v31 = vpack.c.b16 %v274_v23, %v274_v23  ;;  %v961_v32 = vld [vmem:[#allocation8 + $0x40] sm:$0xf]  ;;  %v982_v36 = vor.u32 %v1255_v26, %v979_v27 }
  0x25   :  { %v1252_v33 = vld [vmem:[#allocation8 + $0x44] sm:$0xf0]  ;;  %v1068_v34 = vor.u32 %v1238_v29, %v1067_v28  ;;  %v1261_v35 = vld [vmem:[#allocation8 + $0x94] sm:$0xf]  ;;  %v1003_v37 = vld [vmem:[#allocation8 + $0x98] sm:$0xf0] }
  0x26   :  { %383 = vmatpush.bf16.msra.mxu1 %v978_v17  ;;  %408 = vmatpush.bf16.msra.mxu3 %v990_v25  ;;  %v1059_v38 = vld [vmem:[#allocation7 + $0x60] sm:$0xf]  ;;  %v1236_v39 = vld [vmem:[#allocation7 + $0x64] sm:$0xf0]  ;;  %v1253_v40 = vld [vmem:[#allocation8 + $0x54] sm:$0xf]  ;;  %v1006_v42 = vor.u32 %v1261_v35, %v1003_v37  ;;  %v962_v46 = vor.u32 %v1252_v33, %v961_v32 }
  0x27   :  { %1308 = vset.pattern.permute.xlu0 %v1478_v2  ;;  %221 = vmatpush.bf16.msra.mxu0 %v1220_v5  ;;  %v971_v41 = vld [vmem:[#allocation8 + $0x58] sm:$0xf0]  ;;  %v1060_v43 = vor.u32 %v1236_v39, %v1059_v38  ;;  %v1259_v44 = vld [vmem:[#allocation8 + $0x84] sm:$0xf]  ;;  %v995_v45 = vld [vmem:[#allocation8 + $0x88] sm:$0xf0] }
  0x28   :  { %160 = vperm.xlu0 %1308, %v147_v1   ;;  %402 = vmatpush.bf16.msra.mxu2 %v994_v20  ;;  %v1051_v47 = vld [vmem:[#allocation7 + $0x50] sm:$0xf]  ;;  %v1234_v48 = vld [vmem:[#allocation7 + $0x54] sm:$0xf0]  ;;  %v974_v52 = vor.u32 %v1253_v40, %v971_v41  ;;  %v998_v53 = vor.u32 %v1259_v44, %v995_v45  ;;  %v1251_v54 = vld [vmem:[#allocation8 + $0x44] sm:$0xf] }
  0x29   :  { %v953_v50 = vld [vmem:[#allocation8 + $0x30] sm:$0xf]  ;;  %v1250_v51 = vld [vmem:[#allocation8 + $0x34] sm:$0xf0]  ;;  %v963_v55 = vld [vmem:[#allocation8 + $0x48] sm:$0xf0]  ;;  %v1052_v56 = vor.u32 %v1234_v48, %v1051_v47  ;;  %v273_v48 = vunpack.c.l.b16 %v1591_v18 }
  0x2a   :  { %384 = vmatpush.bf16.msra.mxu1 %v970_v30  ;;  %409 = vmatpush.bf16.msra.mxu3 %v982_v36  ;;  %v1043_v57 = vld [vmem:[#allocation7 + $0x40] sm:$0xf]  ;;  %v1232_v58 = vld [vmem:[#allocation7 + $0x44] sm:$0xf0]  ;;  %v954_v59 = vor.u32 %v1250_v51, %v953_v50  ;;  %v1309_v60 = vld [vmem:[%s1637_s3] ss:$0 sm:$0xff]  ;;  %v966_v0 = vor.u32 %v1251_v54, %v963_v55 }
  0x2b   :  { %222 = vmatpush.bf16.msra.mxu0 %v1219_v6  ;;  %1007 = vmatmul.msk.bf16.vlgmr.msra.gmra.mxu2 %vm378_vm0, %v1594_v31  ;;  %v1310_v61 = vld [vmem:[%s1638_s4] ss:$0 sm:$0xff]  ;;  %v945_v62 = vld [vmem:[#allocation8 + $0x20] sm:$0xf]  ;;  %v1248_v63 = vld [vmem:[#allocation8 + $0x24] sm:$0xf0]  ;;  %v1044_v3 = vor.u32 %v1232_v58, %v1043_v57 }
  0x2c   :  { %427 = vmatpush.bf16.msrb.mxu2 %v1006_v42  ;;  %v1249_v1 = vld [vmem:[#allocation8 + $0x34] sm:$0xf]  ;;  %v955_v2 = vld [vmem:[#allocation8 + $0x38] sm:$0xf0]  ;;  %v1083_v4 = vld [vmem:[#allocation7 + $0x90] sm:$0xf]  ;;  %v946_v8 = vor.u32 %v1248_v63, %v945_v62  ;;  %v275_v62 = vpack.c.b16 %v273_v48, %v273_v48 }
  0x2d   :  { %v1035_v5 = vld [vmem:[#allocation7 + $0x30] sm:$0xf]  ;;  %v1230_v6 = vld [vmem:[#allocation7 + $0x34] sm:$0xf0]  ;;  %v958_v12 = vor.u32 %v1249_v1, %v955_v2  ;;  %v1075_v13 = vld [vmem:[#allocation7 + $0x80] sm:$0xf] }
  0x2e   :  { %385 = vmatpush.bf16.msra.mxu1 %v962_v46  ;;  %410 = vmatpush.bf16.msra.mxu3 %v974_v52  ;;  %v1242_v7 = vld [vmem:[#allocation7 + $0x94] sm:$0xf0]  ;;  %v937_v9 = vld [vmem:[#allocation8 + $0x10] sm:$0xf]  ;;  %v1240_v14 = vld [vmem:[#allocation7 + $0x84] sm:$0xf0]  ;;  %v1036_v19 = vor.u32 %v1230_v6, %v1035_v5 }
  0x2f   :  { %543 = vmatpush.bf16.msrb.mxu0 %v1068_v34  ;;  %v1084_v10 = vor.u32 %v1242_v7, %v1083_v4  ;;  %v1246_v11 = vld [vmem:[#allocation8 + $0x14] sm:$0xf0]  ;;  %v1247_v16 = vld [vmem:[#allocation8 + $0x24] sm:$0xf]  ;;  %v947_v17 = vld [vmem:[#allocation8 + $0x28] sm:$0xf0]  ;;  %v1076_v20 = vor.u32 %v1240_v14, %v1075_v13 }
  0x30   :  { %428 = vmatpush.bf16.msrb.mxu2 %v998_v53  ;;  %v1311_v22 = vld [vmem:[%s1639_s5] ss:$0 sm:$0xff]  ;;  %v1027_v24 = vld [vmem:[#allocation7 + $0x20] sm:$0xf]  ;;  %v1228_v25 = vld [vmem:[#allocation7 + $0x24] sm:$0xf0]  ;;  %v938_v26 = vor.u32 %v1246_v11, %v937_v9  ;;  %v950_v30 = vor.u32 %v1247_v16, %v947_v17 }
  0x31   :  { %v929_v28 = vld [vmem:[#allocation8] sm:$0xf]  ;;  %v1244_v29 = vld [vmem:[#allocation8 + $0x4] sm:$0xf0]  ;;  %v1237_v32 = vld [vmem:[#allocation7 + $0x74] sm:$0xf]  ;;  %v1028_v36 = vor.u32 %v1228_v25, %v1027_v24 }
  0x32   :  { %386 = vmatpush.bf16.msra.mxu1 %v954_v59  ;;  %411 = vmatpush.bf16.msra.mxu3 %v966_v0  ;;  %v1069_v33 = vld [vmem:[#allocation7 + $0x78] sm:$0xf0]  ;;  %v1245_v34 = vld [vmem:[#allocation8 + $0x14] sm:$0xf]  ;;  %v1019_v38 = vld [vmem:[#allocation7 + $0x10] sm:$0xf]  ;;  %v930_v41 = vor.u32 %v1244_v29, %v929_v28 }
  0x33   :  { %544 = vmatpush.bf16.msrb.mxu0 %v1060_v43  ;;  %v939_v35 = vld [vmem:[#allocation8 + $0x18] sm:$0xf0]  ;;  %v1226_v39 = vld [vmem:[#allocation7 + $0x14] sm:$0xf0]  ;;  %v1149_v40 = vld [vmem:[#allocation10 + $0x70] sm:$0xf]  ;;  %v1072_v45 = vor.u32 %v1237_v32, %v1069_v33 }
  0x34   :  { %562 = vmatpush.bf16.msra.mxu2 %v1084_v10  ;;  %v1235_v42 = vld [vmem:[#allocation7 + $0x64] sm:$0xf]  ;;  %v1278_v43 = vld [vmem:[#allocation10 + $0x74] sm:$0xf0]  ;;  %v1061_v46 = vld [vmem:[#allocation7 + $0x68] sm:$0xf0]  ;;  %v942_v50 = vor.u32 %v1245_v34, %v939_v35  ;;  %v1020_v52 = vor.u32 %v1226_v39, %v1019_v38 }
  0x35   :  { %v1243_v47 = vld [vmem:[#allocation8 + $0x4] sm:$0xf]  ;;  %v931_v51 = vld [vmem:[#allocation8 + $0x8] sm:$0xf0]  ;;  %v1141_v53 = vld [vmem:[#allocation10 + $0x60] sm:$0xf]  ;;  %v1064_v18 = vor.u32 %v1235_v42, %v1061_v46 }
  0x36   :  { %387 = vmatpush.bf16.msra.mxu1 %v946_v8  ;;  %412 = vmatpush.bf16.msra.mxu3 %v958_v12  ;;  %v1276_v54 = vld [vmem:[#allocation10 + $0x64] sm:$0xf0]  ;;  %v1241_v57 = vld [vmem:[#allocation7 + $0x94] sm:$0xf]  ;;  %v1085_v59 = vld [vmem:[#allocation7 + $0x98] sm:$0xf0]  ;;  %v934_v2 = vor.u32 %v1243_v47, %v931_v51 }
  0x37   :  { %545 = vmatpush.bf16.msrb.mxu0 %v1052_v56  ;;  %v1011_v56 = vld [vmem:[#allocation7] sm:$0xf]  ;;  %v1142_v58 = vor.u32 %v1276_v54, %v1141_v53  ;;  %v230_v63 = vld [vmem:[%s1654_s23] sm:$0xff]  ;;  %v1133_v0 = vld [vmem:[#allocation10 + $0x50] sm:$0xf]  ;;  %v1088_v6 = vor.u32 %v1241_v57, %v1085_v59 }
  0x38   :  { %563 = vmatpush.bf16.msra.mxu2 %v1076_v20  ;;  %v1274_v1 = vld [vmem:[#allocation10 + $0x54] sm:$0xf0]  ;;  %v1053_v4 = vld [vmem:[#allocation7 + $0x58] sm:$0xf0]  ;;  %v1239_v7 = vld [vmem:[#allocation7 + $0x84] sm:$0xf]  ;;  %v436_v9 = vunpack.c.h.b16 %v230_v63 }
  0x39   :  { %v1077_v10 = vld [vmem:[#allocation7 + $0x88] sm:$0xf0]  ;;  %v1275_v11 = vld [vmem:[#allocation10 + $0x64] sm:$0xf]  ;;  %v1134_v13 = vor.u32 %v1274_v1, %v1133_v0  ;;  %v1125_v17 = vld [vmem:[#allocation10 + $0x40] sm:$0xf] }
  0x3a   :  { %388 = vmatpush.bf16.msra.mxu1 %v938_v26  ;;  %413 = vmatpush.bf16.msra.mxu3 %v950_v30  ;;  %v1143_v12 = vld [vmem:[#allocation10 + $0x68] sm:$0xf0]  ;;  %v1080_v20 = vor.u32 %v1239_v7, %v1077_v10  ;;  %v1135_v24 = vld [vmem:[#allocation10 + $0x58] sm:$0xf0]  ;;  %v435_v26 = vunpack.c.l.b16 %v230_v63  ;;  %v1229_v28 = vld [vmem:[#allocation7 + $0x34] sm:$0xf] }
  0x3b   :  { %546 = vmatpush.bf16.msrb.mxu0 %v1044_v3  ;;  %1008 = vmatmul.msk.bf16.vlgmr.msrb.gmra.mxu2 %vm378_vm0, %v1594_v31  ;;  %v1224_v31 = vld [vmem:[#allocation7 + $0x4] sm:$0xf0]  ;;  %v1233_v3 = vld [vmem:[#allocation7 + $0x54] sm:$0xf]  ;;  %v1045_v16 = vld [vmem:[#allocation7 + $0x48] sm:$0xf0] }
  0x3c   :  { %v1012_v5 = vor.u32 %v1224_v31, %v1011_v56  ;;  %v1056_v14 = vor.u32 %v1233_v3, %v1053_v4  ;;  %v1037_v29 = vld [vmem:[#allocation7 + $0x38] sm:$0xf0]  ;;  %v1117_v32 = vld [vmem:[#allocation10 + $0x30] sm:$0xf]  ;;  %v1270_v33 = vld [vmem:[#allocation10 + $0x34] sm:$0xf0] }
  0x3d   :  { %v1271_v34 = vld [vmem:[#allocation10 + $0x44] sm:$0xf]  ;;  %v1127_v35 = vld [vmem:[#allocation10 + $0x48] sm:$0xf0]  ;;  %v1109_v42 = vld [vmem:[#allocation10 + $0x20] sm:$0xf] }
  0x3e   :  { %389 = vmatpush.bf16.msra.mxu1 %v930_v41  ;;  %414 = vmatpush.bf16.msra.mxu3 %v942_v50  ;;  %v1227_v38 = vld [vmem:[#allocation7 + $0x24] sm:$0xf]  ;;  %v1029_v39 = vld [vmem:[#allocation7 + $0x28] sm:$0xf0]  ;;  %v1130_v41 = vor.u32 %v1271_v34, %v1127_v35  ;;  %v1225_v47 = vld [vmem:[#allocation7 + $0x14] sm:$0xf] }
  0x3f   :  { %547 = vmatpush.bf16.msrb.mxu0 %v1036_v19  ;;  %v1272_v19 = vld [vmem:[#allocation10 + $0x44] sm:$0xf0]  ;;  %v1032_v46 = vor.u32 %v1227_v38, %v1029_v39  ;;  %v1021_v48 = vld [vmem:[#allocation7 + $0x18] sm:$0xf0]  ;;  %v1267_v51 = vld [vmem:[#allocation10 + $0x24] sm:$0xf] }
  0x40   :  { %v1024_v53 = vor.u32 %v1225_v47, %v1021_v48  ;;  %v1223_v54 = vld [vmem:[#allocation7 + $0x4] sm:$0xf]  ;;  %v1101_v57 = vld [vmem:[#allocation10 + $0x10] sm:$0xf]  ;;  %v1265_v59 = vld [vmem:[#allocation10 + $0x14] sm:$0xf] }
  0x41   :  { %390 = vmatmul.bf16.vlgmr.msra.gmra.mxu1 %v275_v62  ;;  %v1264_v63 = vld [vmem:[#allocation10 + $0x4] sm:$0xf0]  ;;  %v1263_v0 = vld [vmem:[#allocation10 + $0x4] sm:$0xf]  ;;  %v1289_v34 = vld [vmem:[#allocation11 + $0x50] sm:$0xff] }
  0x42   :  { %569 = vmatpush.bf16.msrb.mxu1 %v1072_v45  ;;  %415 = vmatpush.bf16.msra.mxu3 %v934_v2  ;;  %v1119_v45 = vld [vmem:[#allocation10 + $0x38] sm:$0xf0]  ;;  %v1095_v2 = vld [vmem:[#allocation10 + $0x8] sm:$0xf0]  ;;  %v1287_v47 = vld [vmem:[#allocation11 + $0x40] sm:$0xff] }
  0x43   :  { %548 = vmatpush.bf16.msrb.mxu0 %v1028_v36  ;;  %v437_v36 = vpack.c.b16 %v435_v26, %v435_v26  ;;  %v1098_v3 = vor.u32 %v1263_v0, %v1095_v2  ;;  %v1280_v48 = vld [vmem:[#allocation11 + $0x8] sm:$0xff] }
  0x45   :  { %416 = vmatmul.bf16.vlgmr.msra.gmra.mxu3 %v275_v62  ;;  %v1093_v62 = vld [vmem:[#allocation10] sm:$0xf] }
  0x46   :  { %570 = vmatpush.bf16.msrb.mxu1 %v1064_v18  ;;  %588 = vmatpush.bf16.msrb.mxu3 %v1088_v6  ;;  %v1094_v1 = vor.u32 %v1264_v63, %v1093_v62  ;;  %v1312_v6 = vld [vmem:[%s1641_s7] ss:$0 sm:$0xff] }
  0x47   :  { %549 = vmatpush.bf16.msrb.mxu0 %v1020_v52  ;;  %v1111_v52 = vld [vmem:[#allocation10 + $0x28] sm:$0xf0] }
  0x48   :  { %v1114_v56 = vor.u32 %v1267_v51, %v1111_v52 }
  0x4a   :  { %571 = vmatpush.bf16.msrb.mxu1 %v1056_v14  ;;  %589 = vmatpush.bf16.msrb.mxu3 %v1080_v20  ;;  %v1292_v20 = vld [vmem:[#allocation11 + $0x68] sm:$0xff] }
  0x4b   :  { %550 = vmatpush.bf16.msrb.mxu0 %v1012_v5 }
  0x91   :  { %v152_v49 = vpop.permute.xlu0 %151 }
  0x92   :  { %v157_v21 = vmul.f32 %v1309_v60, %v152_v49  ;;  %v1150_v49 = vor.u32 %v1278_v43, %v1149_v40  ;;  %v1277_v60 = vld [vmem:[#allocation10 + $0x74] sm:$0xf]  ;;  %v1118_v40 = vor.u32 %v1270_v33, %v1117_v32  ;;  %v1268_v43 = vld [vmem:[#allocation10 + $0x24] sm:$0xf0] }
  0x94   :  { %691 = vmatpush.bf16.msrb.mxu2 %v1150_v49  ;;  %v1110_v49 = vor.u32 %v1268_v43, %v1109_v42 }
  0x98   :  { %692 = vmatpush.bf16.msrb.mxu2 %v1142_v58  ;;  %v1266_v58 = vld [vmem:[#allocation10 + $0x14] sm:$0xf0] }
  0x9a   :  { %v161_v15 = vpop.permute.xlu0 %160 }
  0x9b   :  { %v166_v23 = vmul.f32 %v1310_v61, %v161_v15  ;;  %v1151_v61 = vld [vmem:[#allocation10 + $0x78] sm:$0xf0]  ;;  %v1231_v15 = vld [vmem:[#allocation7 + $0x44] sm:$0xf] }
  0x9c   :  { %v1154_v8 = vor.u32 %v1277_v60, %v1151_v61  ;;  %693 = vmatpush.bf16.msrb.mxu2 %v1134_v13  ;;  %v1048_v25 = vor.u32 %v1231_v15, %v1045_v16  ;;  %v1102_v60 = vor.u32 %v1266_v58, %v1101_v57  ;;  %v1103_v61 = vld [vmem:[#allocation10 + $0x18] sm:$0xf0]  ;;  %v1293_v15 = vld [vmem:[#allocation11 + $0x70] sm:$0xff] }
  0x9d   :  { %v167_v27 = vadd.f32 %v166_v23, %v157_v21  ;;  %v1146_v21 = vor.u32 %v1275_v11, %v1143_v12  ;;  %v1273_v23 = vld [vmem:[#allocation10 + $0x54] sm:$0xf]  ;;  %v1106_v18 = vor.u32 %v1265_v59, %v1103_v61  ;;  %v1294_v11 = vld [vmem:[#allocation11 + $0x78] sm:$0xff] }
  0x9e   :  { %v1138_v30 = vor.u32 %v1273_v23, %v1135_v24  ;;  %572 = vmatpush.bf16.msrb.mxu1 %v1048_v25  ;;  %v1286_v12 = vld [vmem:[#allocation11 + $0x38] sm:$0xff]  ;;  %v1285_v16 = vld [vmem:[#allocation11 + $0x30] sm:$0xff]  ;;  %v1291_v24 = vld [vmem:[#allocation11 + $0x60] sm:$0xff] }
  0x9f   :  { %v172_v37 = vadd.f32 %v1311_v22, %v167_v27  ;;  %v438_v22 = vpack.c.b16 %v436_v9, %v436_v9  ;;  %v1126_v27 = vor.u32 %v1272_v19, %v1125_v17  ;;  %863 = vmatpush.bf16.msra.mxu3 %v1286_v12  ;;  %v1283_v25 = vld [vmem:[#allocation11 + $0x20] sm:$0xff] }
  0xa1   :  { %v173_v44 = vmax.f32 %v172_v37, 0.0  ;;  %1089 = vmatmul.msk.bf16.vlgmr.msra.gmra.mxu2 %vm378_vm0, %v438_v22  ;;  %v1040_v37 = vor.u32 %v1229_v28, %v1037_v29  ;;  %1090 = vmatmul.msk.bf16.vlgmr.msrb.gmra.mxu3 %vm378_vm0, %v438_v22  ;;  %v1290_v29 = vld [vmem:[#allocation11 + $0x58] sm:$0xff] }
  0xa2   :  { %694 = vmatpush.bf16.msrb.mxu2 %v1126_v27 }
  0xa3   :  { %v174_v55 = vpack.c.bf16 %v173_v44, %v173_v44  ;;  %v1269_v44 = vld [vmem:[#allocation10 + $0x34] sm:$0xf]  ;;  %573 = vmatpush.bf16.msrb.mxu1 %v1040_v37  ;;  %864 = vmatpush.bf16.msra.mxu3 %v1285_v16 }
  0xa4   :  { %v1122_v50 = vor.u32 %v1269_v44, %v1119_v45  ;;  %v1282_v44 = vld [vmem:[#allocation11 + $0x18] sm:$0xff]  ;;  %v1288_v45 = vld [vmem:[#allocation11 + $0x48] sm:$0xff] }
  0xa5   :  { %926 = vmatmul.msk.bf16.vlgmr.msra.gmra.mxu0 %vm211_vm1, %v174_v55  ;;  %v1013_v55 = vld [vmem:[#allocation7 + $0x8] sm:$0xf0] }
  0xa6   :  { %704 = vmatpush.bf16.msra.mxu0 %v1154_v8  ;;  %695 = vmatpush.bf16.msrb.mxu2 %v1118_v40  ;;  %v1016_v31 = vor.u32 %v1223_v54, %v1013_v55 }
  0xa7   :  { %574 = vmatpush.bf16.msrb.mxu1 %v1032_v46  ;;  %v1281_v46 = vld [vmem:[#allocation11 + $0x10] sm:$0xff] }
  0xaa   :  { %705 = vmatpush.bf16.msra.mxu0 %v1146_v21  ;;  %696 = vmatpush.bf16.msrb.mxu2 %v1110_v49  ;;  %v1284_v21 = vld [vmem:[#allocation11 + $0x28] sm:$0xff]  ;;  %v1279_v49 = vld [vmem:[#allocation11] sm:$0xff] }
  0xab   :  { %575 = vmatpush.bf16.msrb.mxu1 %v1024_v53  ;;  %865 = vmatpush.bf16.msra.mxu3 %v1284_v21 }
  0xae   :  { %706 = vmatpush.bf16.msra.mxu0 %v1138_v30  ;;  %697 = vmatpush.bf16.msrb.mxu2 %v1102_v60  ;;  %v404_v4 = vpop.f32.mrf.mxu2 }
  0xaf   :  { %576 = vmatpush.bf16.msrb.mxu1 %v1016_v31  ;;  %866 = vmatpush.bf16.msra.mxu3 %v1283_v25 }
  0xb2   :  { %707 = vmatpush.bf16.msra.mxu0 %v1130_v41  ;;  %577 = vmatmul.bf16.vlgmr.msrb.gmra.mxu1 %v437_v36 }
  0xb3   :  { %698 = vmatpush.bf16.msrb.mxu2 %v1094_v1  ;;  %876 = vmatpush.bf16.msra.mxu1 %v1294_v11  ;;  %v1313_v1 = vld [vmem:[%s1647_s13] ss:$0 sm:$0xff] }
  0xb4   :  { %867 = vmatpush.bf16.msra.mxu3 %v1282_v44 }
  0xb5   :  { %551 = vmatmul.bf16.vlgmr.msrb.gmra.mxu0 %v437_v36 }
  0xb6   :  { %708 = vmatpush.bf16.msra.mxu0 %v1122_v50  ;;  %v406_v5 = vpop.f32.mrf.mxu2  ;;  %v719_v50 = vld [vmem:[%s1645_s11] sm:$0x3] }
  0xb7   :  { %877 = vmatpush.bf16.msra.mxu1 %v1293_v15  ;;  %v722_v51 = vperm.slane %v719_v50, 1  ;;  %v1314_v5 = vld [vmem:[%s1648_s14] ss:$0 sm:$0xff] }
  0xb8   :  { %868 = vmatpush.bf16.msra.mxu3 %v1281_v46 }
  0xba   :  { %709 = vmatpush.bf16.msra.mxu0 %v1114_v56  ;;  %v721_v56 = vperm.slane %v719_v50, 0 }
  0xbb   :  { %878 = vmatpush.bf16.msra.mxu1 %v1292_v20 }
  0xbc   :  { %869 = vmatpush.bf16.msra.mxu3 %v1280_v48 }
  0xbe   :  { %710 = vmatpush.bf16.msra.mxu0 %v1106_v18  ;;  %v430_v9 = vpop.f32.mrf.mxu2  ;;  %v391_v10 = vpop.f32.mrf.mxu1 }
  0xbf   :  { %v405_v14 = vadd.f32 %v404_v4, %v391_v10  ;;  %879 = vmatpush.bf16.msra.mxu1 %v1291_v24 }
  0xc0   :  { %870 = vmatpush.bf16.msra.mxu3 %v1279_v49 }
  0xc2   :  { %711 = vmatpush.bf16.msra.mxu0 %v1098_v3 }
  0xc3   :  { %880 = vmatpush.bf16.msra.mxu1 %v1290_v29 }
  0xc6   :  { %v432_v22 = vpop.f32.mrf.mxu2  ;;  %v393_v23 = vpop.f32.mrf.mxu1 }
  0xc7   :  { %881 = vmatpush.bf16.msra.mxu1 %v1289_v34 }
  0xc8   :  { %v417_v26 = vpop.f32.mrf.mxu3 }
  0xc9   :  { %v431_v27 = vadd.f32 %v430_v9, %v417_v26  ;;  %v898_v9 = vstv %s1649_s15 }
  0xcb   :  { %882 = vmatpush.bf16.msra.mxu1 %v1288_v45 }
  0xcf   :  { %883 = vmatpush.bf16.msra.mxu1 %v1287_v47 }
  0xd0   :  { %v419_v35 = vpop.f32.mrf.mxu3 }
 0x122   :  { %v224_v7 = vpop.f32.mrf.mxu0 }
 0x123   :  { %v225_v8 = vadd.f32 %v1312_v6, %v224_v7 }
 0x124   :  { %v565_v32 = vpop.f32.mrf.mxu2  ;;  %v591_v38 = vpop.f32.mrf.mxu3 }
 0x125   :  { %v228_v13 = vmax.f32 %v225_v8, 0.0 }
 0x127   :  { %v229_v17 = vpack.c.bf16 %v228_v13, %v228_v13 }
 0x129   :  { %699 = vmatmul.bf16.vlgmr.msrb.gmra.mxu2 %v229_v17  ;;  %712 = vmatmul.bf16.vlgmr.msra.gmra.mxu0 %v229_v17 }
 0x12a   :  { %v226_v19 = vpop.f32.mrf.mxu0 }
 0x12c   :  { %v567_v37 = vpop.f32.mrf.mxu2  ;;  %v593_v42 = vpop.f32.mrf.mxu3 }
 0x12f   :  { %v578_v39 = vpop.f32.mrf.mxu1 }
 0x130   :  { %v579_v40 = vadd.f32 %v578_v39, %v431_v27 }
 0x132   :  { %v552_v28 = vpop.f32.mrf.mxu0  ;;  %v592_v41 = vadd.f32 %v591_v38, %v579_v40 }
 0x133   :  { %v553_v30 = vadd.f32 %v552_v28, %v405_v14 }
 0x135   :  { %v566_v33 = vadd.f32 %v565_v32, %v553_v30 }
 0x137   :  { %v580_v43 = vpop.f32.mrf.mxu1 }
 0x13a   :  { %v554_v36 = vpop.f32.mrf.mxu0 }
 0x1a6   :  { %v713_v52 = vpop.f32.mrf.mxu0 }
 0x1a7   :  { %v718_v53 = vadd.f32 %v713_v52, %v592_v41 }
 0x1a9   :  { %v726_v54 = vadd.f32 %v722_v51, %v718_v53 }
 0x1ab   :  { %v728_v55 = vmax.f32 %v726_v54, 0.0 }
 0x1ac   :  { %v700_v31 = vpop.f32.mrf.mxu2 }
 0x1ad   :  { %v730_v57 = vpack.c.bf16 %v728_v55, %v728_v55  ;;  %v717_v58 = vadd.f32 %v700_v31, %v566_v33 }
 0x1ae   :  { %v715_v59 = vpop.f32.mrf.mxu0 }
 0x1af   :  { %v725_v60 = vadd.f32 %v721_v56, %v717_v58  ;;  %884 = vmatmul.bf16.vlgmr.msra.gmra.mxu1 %v730_v57 }
 0x1b1   :  { %v727_v61 = vmax.f32 %v725_v60, 0.0 }
 0x1b3   :  { %v729_v18 = vpack.c.bf16 %v727_v61, %v727_v61 }
 0x1b4   :  { %v702_v62 = vpop.f32.mrf.mxu2 }
 0x1b5   :  { %871 = vmatmul.bf16.vlgmr.msra.gmra.mxu3 %v729_v18 }
 0x22c   :  { %v885_v63 = vpop.f32.mrf.mxu1 }
 0x234   :  { %v887_v0 = vpop.f32.mrf.mxu1 }
 0x238   :  { %v872_v2 = vpop.f32.mrf.mxu3 }
 0x239   :  { %v873_v3 = vadd.f32 %v1313_v1, %v872_v2 }
 0x23b   :  { %v886_v4 = vadd.f32 %v885_v63, %v873_v3 }
 0x23d   :  { %v889_v6 = vmax.f32 %v886_v4, 0.0 }
 0x23f   :  { %v894_v7 = vmul.f32 %v1314_v5, %v889_v6 }
 0x240   :  { %v874_v8 = vpop.f32.mrf.mxu3 }
 0x241   :  { %895 = vadd.xlane.f32.xlu1 %v894_v7 }
 0x2b4   :  { %v896_v10 = vpop.xlane.xlu1 %895 }
 0x2b5   :  { %v899_v11 = vadd.f32 %v898_v9, %v896_v10 }
 0x2b7   :  { %901 = vst.msk [vmem:[%s1650_s16] sm:$0xff] %vm900_vm2, %v899_v11 }
 0x2b8   :  { %906 = vsyncpa [#allocation4], 1 }
 0x2b9   :  { %907 = vsyncpa [#allocation6], 1 }
 0x2ba   :  { %908 = vsyncpa [#allocation9], 1 }
 0x2bb   :  { %909 = vsyncpa [#allocation12], 1 }

</bundles_post_ra>
